<compile_context>
chip_gen: v7x
topology: tpu7x:2x2x1
jax: 0.10.0
libtpu: 0.0.40
codegen_flags: <defaults>
</compile_context>

<pallas_src>
import functools

import jax
import jax.numpy as jnp
from jax.experimental import pallas as pl
from jax.experimental.pallas import tpu as pltpu

NEG_INF = -1e30


def _round_up(n, m):
    return (n + m - 1) // m * m


# ---------------------------------------------------------------------------
# In-kernel epilogue: log-sum-exp + Gumbel-max sample + log-prob, packed into
# the spare (padded) class lanes of the logits slab -> ONE full-lane store.
# ---------------------------------------------------------------------------
def _pack_logits_lse_action_pf(logits, gumbel, K):
    KP = logits.shape[1]
    col = jax.lax.broadcasted_iota(jnp.int32, logits.shape, 1)

    # Numerically stable log-sum-exp; padded columns carry bias -1e30 -> exp 0.
    m = jnp.max(logits, axis=1, keepdims=True)
    lse = m + jnp.log(jnp.sum(jnp.exp(logits - m), axis=1, keepdims=True))

    # Gumbel-max trick == Categorical(logits).sample() (ties -> lowest index).
    pert = logits + gumbel
    pmax = jnp.max(pert, axis=1, keepdims=True)
    idx = jnp.min(jnp.where(pert >= pmax, col, KP), axis=1, keepdims=True)

    # log-prob of the sampled class: logits[idx] - lse.
    pf = jnp.sum(jnp.where(col == idx, logits, 0.0), axis=1, keepdims=True) - lse

    # Pack: cols [0,K) = logits, K = lse, K+1 = action, K+2 = pf  (KP >= K+3).
    out = jnp.where(col < K, logits, 0.0)
    out = jnp.where(col == K, lse, out)
    out = jnp.where(col == K + 1, idx.astype(jnp.float32), out)
    out = jnp.where(col == K + 2, pf, out)
    return out


# ---------------------------------------------------------------------------
# Kernels
# ---------------------------------------------------------------------------
def _lr_pair_kernel(s_ref, l_ref, r_ref, gl_ref, gr_ref,
                    w1s_ref, w1t_ref, b1_ref, w2_ref, b2_ref,
                    outl_ref, outr_ref, *, K):
    """Fused left/right heads (shared params): the summary GEMM is computed
    once and reused by both heads.  bf16 MXU operands, f32 accumulation."""
    w1s, w1t, w2 = w1s_ref[...], w1t_ref[...], w2_ref[...]
    b1, b2 = b1_ref[...], b2_ref[...]
    hs = jnp.dot(s_ref[...].astype(jnp.bfloat16), w1s,
                 preferred_element_type=jnp.float32)          # shared GEMM

    def head(t_ref, g_ref, o_ref):
        h = hs + jnp.dot(t_ref[...].astype(jnp.bfloat16), w1t,
                         preferred_element_type=jnp.float32) + b1
        h = jnp.maximum(h, 0.0)
        logits = jnp.dot(h.astype(jnp.bfloat16), w2,
                         preferred_element_type=jnp.float32) + b2
        o_ref[...] = _pack_logits_lse_action_pf(logits, g_ref[...], K)

    head(l_ref, gl_ref, outl_ref)
    head(r_ref, gr_ref, outr_ref)


def _single_head_kernel(s_ref, l_ref, r_ref, g_ref,
                        w1s_ref, w1l_ref, w1r_ref, b1_ref, w2_ref, b2_ref,
                        out_ref, *, K):
    """Single head on the 3-part rep [summary, left, right] (no concat)."""
    h = (jnp.dot(s_ref[...].astype(jnp.bfloat16), w1s_ref[...],
                 preferred_element_type=jnp.float32)
         + jnp.dot(l_ref[...].astype(jnp.bfloat16), w1l_ref[...],
                   preferred_element_type=jnp.float32)
         + jnp.dot(r_ref[...].astype(jnp.bfloat16), w1r_ref[...],
                   preferred_element_type=jnp.float32)
         + b1_ref[...])
    h = jnp.maximum(h, 0.0)
    logits = jnp.dot(h.astype(jnp.bfloat16), w2_ref[...],
                     preferred_element_type=jnp.float32) + b2_ref[...]
    out_ref[...] = _pack_logits_lse_action_pf(logits, g_ref[...], K)


# ---------------------------------------------------------------------------
# Tiling / wrapper helpers
# ---------------------------------------------------------------------------
def _choose_block_rows(B):
    # Big tiles for a memory-bound kernel (~85% HBM roofline at 512 rows), but
    # at least 2 grid tiles when B allows so v7x's two TensorCores both work.
    if B <= 16:
        return _round_up(B, 8)
    return min(512, _round_up((B + 1) // 2, 16))


def _compiler_params(block_rows, d, hp, kp, n_x, n_g, n_out, n_w1):
    act = (n_x * block_rows * d + (n_g + n_out) * block_rows * kp) * 4
    wts = (n_w1 * d * hp + hp * kp) * 2 + (hp + kp) * 4
    est = 2 * (act + wts)            # double-buffered pipeline stages
    # TODO(synk): single-buffer the constant weight blocks
    #   (pipeline_mode=pl.Buffered(1)) and re-derive this cap per generation
    #   (v7x has only 64 MiB physical VMEM per TensorCore).
    limit = int(min(48 << 20, max(16 << 20, 2 * est)))
    return pltpu.CompilerParams(dimension_semantics=("parallel",),
                                vmem_limit_bytes=limit)


def _pad_rows(x, rows):
    return x if x.shape[0] == rows else jnp.pad(x, ((0, rows - x.shape[0]), (0, 0)))


def _unpack(out, B, K):
    logits = out[:B, :K]
    lse = out[:B, K]
    act = out[:B, K + 1].astype(jnp.int32)
    pf = out[:B, K + 2]
    return logits, lse, act, pf


def lr_pair_heads(summary, left, right, head, key):
    """Fused MLP -> log-softmax stats -> Gumbel-max sample for both l/r heads."""
    B, D = summary.shape
    K = head["actions_list"].shape[0]
    Hp, KP = head["w2"].shape
    block_rows = _choose_block_rows(B)
    rows = _round_up(B, block_rows)
    summary, left, right = (_pad_rows(a, rows) for a in (summary, left, right))

    # TODO(synk): generate in-kernel with pltpu.prng_random_bits on real TPU
    # (saves one (rows, KP) f32 read per head); streamed in here because the
    # hardware PRNG has no CPU / interpret-mode lowering.
    kl, kr = jax.random.split(key)
    gl = jax.random.gumbel(kl, (rows, KP), jnp.float32)
    gr = jax.random.gumbel(kr, (rows, KP), jnp.float32)

    x_spec = pl.BlockSpec((block_rows, D), lambda i: (i, 0))
    g_spec = pl.BlockSpec((block_rows, KP), lambda i: (i, 0))
    out_spec = pl.BlockSpec((block_rows, KP), lambda i: (i, 0))

    def w_spec(shape):
        return pl.BlockSpec(shape, lambda i: (0, 0))

    outl, outr = pl.pallas_call(
        functools.partial(_lr_pair_kernel, K=K),
        out_shape=(jax.ShapeDtypeStruct((rows, KP), jnp.float32),
                   jax.ShapeDtypeStruct((rows, KP), jnp.float32)),
        grid=(rows // block_rows,),
        in_specs=[x_spec, x_spec, x_spec, g_spec, g_spec,
                  w_spec((D, Hp)), w_spec((D, Hp)), w_spec((1, Hp)),
                  w_spec((Hp, KP)), w_spec((1, KP))],
        out_specs=(out_spec, out_spec),
        compiler_params=_compiler_params(block_rows, D, Hp, KP,
                                         n_x=3, n_g=2, n_out=2, n_w1=2),
    )(summary, left, right, gl, gr,
      head["w1"][0], head["w1"][1], head["b1"], head["w2"], head["b2"])
    return _unpack(outl, B, K), _unpack(outr, B, K)


def single_head(summary, left, right, head, key):
    """Single head on [summary, left, right] (root head / non-independent)."""
    B, D = summary.shape
    K = head["actions_list"].shape[0]
    Hp, KP = head["w2"].shape
    block_rows = _choose_block_rows(B)
    rows = _round_up(B, block_rows)
    summary, left, right = (_pad_rows(a, rows) for a in (summary, left, right))
    g = jax.random.gumbel(key, (rows, KP), jnp.float32)

    x_spec = pl.BlockSpec((block_rows, D), lambda i: (i, 0))
    g_spec = pl.BlockSpec((block_rows, KP), lambda i: (i, 0))
    out_spec = pl.BlockSpec((block_rows, KP), lambda i: (i, 0))

    def w_spec(shape):
        return pl.BlockSpec(shape, lambda i: (0, 0))

    out = pl.pallas_call(
        functools.partial(_single_head_kernel, K=K),
        out_shape=jax.ShapeDtypeStruct((rows, KP), jnp.float32),
        grid=(rows // block_rows,),
        in_specs=[x_spec, x_spec, x_spec, g_spec,
                  w_spec((D, Hp)), w_spec((D, Hp)), w_spec((D, Hp)),
                  w_spec((1, Hp)), w_spec((Hp, KP)), w_spec((1, KP))],
        out_specs=out_spec,
        compiler_params=_compiler_params(block_rows, D, Hp, KP,
                                         n_x=3, n_g=1, n_out=1, n_w1=3),
    )(summary, left, right, g,
      head["w1"][0], head["w1"][1], head["w1"][2],
      head["b1"], head["w2"], head["b2"])
    return _unpack(out, B, K)


# ---------------------------------------------------------------------------
# Module-level forward (mirrors EdgesModelCategorical.forward)
# ---------------------------------------------------------------------------
def edges_model_categorical_forward(params, summary_reps, left_trees,
                                    right_trees, input_dict, key, *,
                                    edges_independent=True,
                                    first_edges_flag=None):
    batch_nb_seq = input_dict["batch_nb_seq"]
    random_spec = input_dict.get("random_spec", None)
    input_edge_actions = input_dict.get("input_edge_actions", None)
    # TODO(synk): random_spec['random_action_prob'] > 0 resampling and the
    #             temperature ('T') variant need host-side data-dependent
    #             randomness; only the default (prob == 0.0) path is kernelized.
    del random_spec

    if first_edges_flag is None:
        # TODO(synk): eager-only fallback replicating torch's `.item()`; pass
        #             first_edges_flag statically to avoid this host sync.
        first_edges_flag = bool(int(batch_nb_seq[0]) > 2)

    ret = {}
    if first_edges_flag:
        if edges_independent:
            (l_logits, l_lse, l_act, l_pf), (r_logits, r_lse, r_act, r_pf) = \
                lr_pair_heads(summary_reps, left_trees, right_trees,
                              params["lr"], key)
            actions = jnp.stack([l_act, r_act], axis=1)          # (B, 2)
            ret["first_edges_ret"] = {"l_logits": l_logits, "r_logits": r_logits}
            ret["first_edges_actions"] = actions
            edge_actions = actions
            pf_total = l_pf + r_pf
        else:
            logits, lse, act, pf_total = single_head(
                summary_reps, left_trees, right_trees, params["lr"], key)
            ret["first_edges_ret"] = {"logits": logits}
            ret["first_edges_actions"] = act
            edge_actions = act
    else:
        logits, lse, act, pf_total = single_head(
            summary_reps, left_trees, right_trees, params["root"], key)
        ret["root_edges_ret"] = {"logits": logits}
        ret["root_edges_actions"] = act
        edge_actions = act

    # Optional overwrite of leading actions, then recompute their log-probs
    # (logp = logits - lse, gathered outside the kernel).
    if input_edge_actions is not None:
        n = input_edge_actions.shape[0]
        edge_actions = edge_actions.at[:n].set(input_edge_actions)
        if first_edges_flag and edges_independent:
            pf_l = jnp.take_along_axis(
                l_logits, edge_actions[:, 0:1], axis=1)[:, 0] - l_lse
            pf_r = jnp.take_along_axis(
                r_logits, edge_actions[:, 1:2], axis=1)[:, 0] - r_lse
            pf_total = pf_l + pf_r
        else:
            pf_total = jnp.take_along_axis(
                logits, edge_actions[:, None], axis=1)[:, 0] - lse

    ret["edge_actions"] = edge_actions

    # compute_log_path_pf: mask per-row contributions by the batch_nb_seq flags.
    mask = (batch_nb_seq > 2) if first_edges_flag else (batch_nb_seq == 2)
    ret["log_paths_pf"] = jnp.where(mask, pf_total, 0.0).astype(jnp.float32)
    return ret


# ---------------------------------------------------------------------------
# Parameter init (PyTorch-Linear-style uniform) + one-time kernel-layout prep
# ---------------------------------------------------------------------------
def _init_linear(key, fan_in, fan_out):
    kw, kb = jax.random.split(key)
    bound = 1.0 / jnp.sqrt(jnp.float32(fan_in))
    w = jax.random.uniform(kw, (fan_in, fan_out), jnp.float32, -bound, bound)
    b = jax.random.uniform(kb, (fan_out,), jnp.float32, -bound, bound)
    return w, b


def init_params(key, d_in_lr, d_in_root, hidden, k_lr, k_root):
    k1, k2, k3, k4 = jax.random.split(key, 4)
    lr_w1, lr_b1 = _init_linear(k1, d_in_lr, hidden)
    lr_w2, lr_b2 = _init_linear(k2, hidden, k_lr)
    rt_w1, rt_b1 = _init_linear(k3, d_in_root, hidden)
    rt_w2, rt_b2 = _init_linear(k4, hidden, k_root)
    return {
        "lr": {"w1": lr_w1, "b1": lr_b1, "w2": lr_w2, "b2": lr_b2},
        "root": {"w1": rt_w1, "b1": rt_b1, "w2": rt_w2, "b2": rt_b2},
    }


def prepare_params(raw_params, d_model):
    """One-time weight prep: split W1 per input part (no rep concatenation at
    forward time), pad hidden / class dims to the 128-lane width, cast MXU
    operands to bf16 and bake -1e30 into the padded class bias."""
    def prep_head(h):
        w1, b1, w2, b2 = h["w1"], h["b1"], h["w2"], h["b2"]
        din, H = w1.shape
        K = w2.shape[1]
        assert din % d_model == 0, "head input size must be a multiple of d_model"
        assert K < (1 << 24), "sampled actions round-trip through f32 lanes"
        Hp = _round_up(H, 128)
        # Spare class lanes carry lse / action / pf.
        # TODO(synk): if K is an exact multiple of 128 this allocates an extra
        #             128-lane group; a transposed (3, rows) aux block is tighter.
        KP = _round_up(K + 3, 128)
        parts = []
        for p in range(din // d_model):
            wp = jnp.zeros((d_model, Hp), jnp.bfloat16)
            wp = wp.at[:, :H].set(
                w1[p * d_model:(p + 1) * d_model].astype(jnp.bfloat16))
            parts.append(wp)
        b1p = jnp.zeros((1, Hp), jnp.float32).at[0, :H].set(b1.astype(jnp.float32))
        w2p = jnp.zeros((Hp, KP), jnp.bfloat16).at[:H, :K].set(
            w2.astype(jnp.bfloat16))
        b2p = jnp.full((1, KP), NEG_INF, jnp.float32).at[0, :K].set(
            b2.astype(jnp.float32))
        return {"w1": tuple(parts), "b1": b1p, "w2": w2p, "b2": b2p,
                "actions_list": jnp.arange(K, dtype=jnp.int32)}
    return {name: prep_head(h) for name, h in raw_params.items()}


if __name__ == "__main__":
    key = jax.random.PRNGKey(0)
    B, D, HIDDEN, K_LR, K_ROOT = 8, 32, 32, 8, 4

    kp, k1, k2, k3, ks = jax.random.split(key, 5)
    # HEAD.INPUT_SIZE = 2*D (independent l/r reps), ROOT_EDGE_HEAD.INPUT_SIZE = 3*D
    raw_params = init_params(kp, 2 * D, 3 * D, HIDDEN, K_LR, K_ROOT)
    params = prepare_params(raw_params, D)          # pad/cast ONCE, not per call

    summary_reps = jax.random.normal(k1, (B, D), jnp.float32)
    left_trees = jax.random.normal(k2, (B, D), jnp.float32)
    right_trees = jax.random.normal(k3, (B, D), jnp.float32)

    # jit-able forwards: branch flag is static, no device->host sync.
    fwd_first = jax.jit(functools.partial(
        edges_model_categorical_forward,
        edges_independent=True, first_edges_flag=True))
    fwd_root = jax.jit(functools.partial(
        edges_model_categorical_forward,
        edges_independent=True, first_edges_flag=False))

    # "first edges" branch: all sequences longer than 2 (fused l/r kernel).
    input_dict_first = {"batch_nb_seq": jnp.array([5, 6, 7, 4, 5, 6, 7, 8],
                                                  jnp.int32)}
    ret_first = fwd_first(params, summary_reps, left_trees, right_trees,
                          input_dict_first, ks)
    jax.block_until_ready(ret_first["log_paths_pf"])
    jax.block_until_ready(ret_first["edge_actions"])
    assert ret_first["edge_actions"].shape == (B, 2)
    assert int(jnp.max(ret_first["edge_actions"])) < K_LR
    assert int(jnp.min(ret_first["edge_actions"])) >= 0

    # "root edges" branch: all sequences of length 2 (single 3-part head).
    input_dict_root = {"batch_nb_seq": jnp.full((B,), 2, jnp.int32)}
    ret_root = fwd_root(params, summary_reps, left_trees, right_trees,
                        input_dict_root, ks)
    jax.block_until_ready(ret_root["log_paths_pf"])
    jax.block_until_ready(ret_root["edge_actions"])
    assert int(jnp.max(ret_root["edge_actions"])) < K_ROOT

    # input_edge_actions overwrite path (eager, exercises the outside gather).
    input_dict_ie = {
        "batch_nb_seq": input_dict_first["batch_nb_seq"],
        "input_edge_actions": jnp.zeros((3, 2), jnp.int32),
    }
    ret_ie = edges_model_categorical_forward(
        params, summary_reps, left_trees, right_trees, input_dict_ie, ks,
        edges_independent=True, first_edges_flag=True)
    jax.block_until_ready(ret_ie["log_paths_pf"])

    print("KERNEL_OK")
</pallas_src>

<mosaic_0001>
module attributes {stable_mosaic.version = 11 : i64} {
  func.func @_lr_pair_kernel(%arg0: i32, %arg1: memref<8x32xf32, #tpu.memory_space<vmem>>, %arg2: memref<8x32xf32, #tpu.memory_space<vmem>>, %arg3: memref<8x32xf32, #tpu.memory_space<vmem>>, %arg4: memref<8x128xf32, #tpu.memory_space<vmem>>, %arg5: memref<8x128xf32, #tpu.memory_space<vmem>>, %arg6: memref<32x128xbf16, #tpu.memory_space<vmem>>, %arg7: memref<32x128xbf16, #tpu.memory_space<vmem>>, %arg8: memref<1x128xf32, #tpu.memory_space<vmem>>, %arg9: memref<128x128xbf16, #tpu.memory_space<vmem>>, %arg10: memref<1x128xf32, #tpu.memory_space<vmem>>, %arg11: memref<8x128xf32, #tpu.memory_space<vmem>>, %arg12: memref<8x128xf32, #tpu.memory_space<vmem>>) attributes {dimension_semantics = [#tpu.dimension_semantics<parallel>], iteration_bounds = array<i64: 1>, scalar_prefetch = 0 : i64, scratch_operands = 0 : i64, tpu.core_type = #tpu.core_type<tc>, window_params = [{transform_indices = @transform_0, window_bounds = array<i64: 8, 32>}, {transform_indices = @transform_1, window_bounds = array<i64: 8, 32>}, {transform_indices = @transform_2, window_bounds = array<i64: 8, 32>}, {transform_indices = @transform_3, window_bounds = array<i64: 8, 128>}, {transform_indices = @transform_4, window_bounds = array<i64: 8, 128>}, {pipeline_mode = #tpu.pipeline_mode<synchronous>, transform_indices = @transform_5, window_bounds = array<i64: 32, 128>}, {pipeline_mode = #tpu.pipeline_mode<synchronous>, transform_indices = @transform_6, window_bounds = array<i64: 32, 128>}, {pipeline_mode = #tpu.pipeline_mode<synchronous>, transform_indices = @transform_7, window_bounds = array<i64: 1, 128>}, {pipeline_mode = #tpu.pipeline_mode<synchronous>, transform_indices = @transform_8, window_bounds = array<i64: 128, 128>}, {pipeline_mode = #tpu.pipeline_mode<synchronous>, transform_indices = @transform_9, window_bounds = array<i64: 1, 128>}, {transform_indices = @transform_10, window_bounds = array<i64: 8, 128>}, {transform_indices = @transform_11, window_bounds = array<i64: 8, 128>}]} {
    %c0 = arith.constant 0 : index
    %c0_0 = arith.constant 0 : index
    %0 = vector.load %arg6[%c0, %c0_0] : memref<32x128xbf16, #tpu.memory_space<vmem>>, vector<32x128xbf16>
    %c0_1 = arith.constant 0 : index
    %c0_2 = arith.constant 0 : index
    %1 = vector.load %arg7[%c0_1, %c0_2] : memref<32x128xbf16, #tpu.memory_space<vmem>>, vector<32x128xbf16>
    %c0_3 = arith.constant 0 : index
    %c0_4 = arith.constant 0 : index
    %2 = vector.load %arg9[%c0_3, %c0_4] : memref<128x128xbf16, #tpu.memory_space<vmem>>, vector<128x128xbf16>
    %c0_5 = arith.constant 0 : index
    %c0_6 = arith.constant 0 : index
    %3 = vector.load %arg8[%c0_5, %c0_6] : memref<1x128xf32, #tpu.memory_space<vmem>>, vector<1x128xf32>
    %c0_7 = arith.constant 0 : index
    %c0_8 = arith.constant 0 : index
    %4 = vector.load %arg10[%c0_7, %c0_8] : memref<1x128xf32, #tpu.memory_space<vmem>>, vector<1x128xf32>
    %c0_9 = arith.constant 0 : index
    %c0_10 = arith.constant 0 : index
    %5 = vector.load %arg1[%c0_9, %c0_10] : memref<8x32xf32, #tpu.memory_space<vmem>>, vector<8x32xf32>
    %6 = arith.truncf %5 : vector<8x32xf32> to vector<8x32xbf16>
    %cst = arith.constant dense<0.000000e+00> : vector<8x128xf32>
    %7 = tpu.matmul %6, %0, %cst {dimension_numbers = #tpu.dot_dimension_numbers<[1], [0], [0], [1], [0, 0, 1, 1], [], []>} : vector<8x32xbf16>, vector<32x128xbf16>, vector<8x128xf32> -> vector<8x128xf32>
    %c0_11 = arith.constant 0 : index
    %c0_12 = arith.constant 0 : index
    %8 = vector.load %arg2[%c0_11, %c0_12] : memref<8x32xf32, #tpu.memory_space<vmem>>, vector<8x32xf32>
    %9 = arith.truncf %8 : vector<8x32xf32> to vector<8x32xbf16>
    %cst_13 = arith.constant dense<0.000000e+00> : vector<8x128xf32>
    %10 = tpu.matmul %9, %1, %cst_13 {dimension_numbers = #tpu.dot_dimension_numbers<[1], [0], [0], [1], [0, 0, 1, 1], [], []>} : vector<8x32xbf16>, vector<32x128xbf16>, vector<8x128xf32> -> vector<8x128xf32>
    %11 = arith.addf %7, %10 : vector<8x128xf32>
    %12 = vector.broadcast %3 : vector<1x128xf32> to vector<8x128xf32>
    %13 = arith.addf %11, %12 : vector<8x128xf32>
    %cst_14 = arith.constant 0.000000e+00 : f32
    %14 = vector.broadcast %cst_14 : f32 to vector<8x128xf32>
    %15 = arith.maximumf %13, %14 : vector<8x128xf32>
    %16 = arith.truncf %15 : vector<8x128xf32> to vector<8x128xbf16>
    %cst_15 = arith.constant dense<0.000000e+00> : vector<8x128xf32>
    %17 = tpu.matmul %16, %2, %cst_15 {dimension_numbers = #tpu.dot_dimension_numbers<[1], [0], [0], [1], [0, 0, 1, 1], [], []>} : vector<8x128xbf16>, vector<128x128xbf16>, vector<8x128xf32> -> vector<8x128xf32>
    %18 = vector.broadcast %4 : vector<1x128xf32> to vector<8x128xf32>
    %19 = arith.addf %17, %18 : vector<8x128xf32>
    %c0_16 = arith.constant 0 : index
    %c0_17 = arith.constant 0 : index
    %20 = vector.load %arg4[%c0_16, %c0_17] : memref<8x128xf32, #tpu.memory_space<vmem>>, vector<8x128xf32>
    %21 = tpu.iota {dimensions = array<i32: 1>} : vector<8x128xi32>
    %cst_18 = arith.constant dense<0xFF800000> : vector<8xf32>
    %22 = vector.multi_reduction <maximumf>, %19, %cst_18 [1] : vector<8x128xf32> to vector<8xf32>
    %23 = vector.shape_cast %22 : vector<8xf32> to vector<8x1xf32>
    %24 = vector.broadcast %23 : vector<8x1xf32> to vector<8x128xf32>
    %25 = arith.subf %19, %24 : vector<8x128xf32>
    %26 = math.exp %25 : vector<8x128xf32>
    %cst_19 = arith.constant dense<0.000000e+00> : vector<8xf32>
    %27 = vector.multi_reduction <add>, %26, %cst_19 [1] : vector<8x128xf32> to vector<8xf32>
    %28 = vector.shape_cast %27 : vector<8xf32> to vector<8x1xf32>
    %29 = math.log %28 : vector<8x1xf32>
    %30 = arith.addf %23, %29 : vector<8x1xf32>
    %31 = arith.addf %19, %20 : vector<8x128xf32>
    %cst_20 = arith.constant dense<0xFF800000> : vector<8xf32>
    %32 = vector.multi_reduction <maximumf>, %31, %cst_20 [1] : vector<8x128xf32> to vector<8xf32>
    %33 = vector.shape_cast %32 : vector<8xf32> to vector<8x1xf32>
    %34 = vector.broadcast %33 : vector<8x1xf32> to vector<8x128xf32>
    %35 = arith.cmpf oge, %31, %34 : vector<8x128xf32>
    %c128_i32 = arith.constant 128 : i32
    %36 = vector.broadcast %c128_i32 : i32 to vector<8x128xi32>
    %37 = arith.select %35, %21, %36 : vector<8x128xi1>, vector<8x128xi32>
    %cst_21 = arith.constant dense<2147483647> : vector<8xi32>
    %38 = vector.multi_reduction <minsi>, %37, %cst_21 [1] : vector<8x128xi32> to vector<8xi32>
    %39 = vector.shape_cast %38 : vector<8xi32> to vector<8x1xi32>
    %40 = vector.broadcast %39 : vector<8x1xi32> to vector<8x128xi32>
    %41 = arith.cmpi eq, %21, %40 : vector<8x128xi32>
    %cst_22 = arith.constant 0.000000e+00 : f32
    %42 = vector.broadcast %cst_22 : f32 to vector<8x128xf32>
    %43 = arith.select %41, %19, %42 : vector<8x128xi1>, vector<8x128xf32>
    %cst_23 = arith.constant dense<0.000000e+00> : vector<8xf32>
    %44 = vector.multi_reduction <add>, %43, %cst_23 [1] : vector<8x128xf32> to vector<8xf32>
    %45 = vector.shape_cast %44 : vector<8xf32> to vector<8x1xf32>
    %46 = arith.subf %45, %30 : vector<8x1xf32>
    %c8_i32 = arith.constant 8 : i32
    %47 = vector.broadcast %c8_i32 : i32 to vector<8x128xi32>
    %48 = arith.cmpi slt, %21, %47 : vector<8x128xi32>
    %cst_24 = arith.constant 0.000000e+00 : f32
    %49 = vector.broadcast %cst_24 : f32 to vector<8x128xf32>
    %50 = arith.select %48, %19, %49 : vector<8x128xi1>, vector<8x128xf32>
    %c8_i32_25 = arith.constant 8 : i32
    %51 = vector.broadcast %c8_i32_25 : i32 to vector<8x128xi32>
    %52 = arith.cmpi eq, %21, %51 : vector<8x128xi32>
    %53 = vector.shape_cast %30 : vector<8x1xf32> to vector<8x1xf32>
    %54 = vector.broadcast %53 : vector<8x1xf32> to vector<8x128xf32>
    %55 = arith.select %52, %54, %50 : vector<8x128xi1>, vector<8x128xf32>
    %c9_i32 = arith.constant 9 : i32
    %56 = vector.broadcast %c9_i32 : i32 to vector<8x128xi32>
    %57 = arith.cmpi eq, %21, %56 : vector<8x128xi32>
    %58 = arith.sitofp %39 : vector<8x1xi32> to vector<8x1xf32>
    %59 = vector.shape_cast %58 : vector<8x1xf32> to vector<8x1xf32>
    %60 = vector.broadcast %59 : vector<8x1xf32> to vector<8x128xf32>
    %61 = arith.select %57, %60, %55 : vector<8x128xi1>, vector<8x128xf32>
    %c10_i32 = arith.constant 10 : i32
    %62 = vector.broadcast %c10_i32 : i32 to vector<8x128xi32>
    %63 = arith.cmpi eq, %21, %62 : vector<8x128xi32>
    %64 = vector.shape_cast %46 : vector<8x1xf32> to vector<8x1xf32>
    %65 = vector.broadcast %64 : vector<8x1xf32> to vector<8x128xf32>
    %66 = arith.select %63, %65, %61 : vector<8x128xi1>, vector<8x128xf32>
    %c0_26 = arith.constant 0 : index
    %c0_27 = arith.constant 0 : index
    %67 = vector.load %arg11[%c0_26, %c0_27] : memref<8x128xf32, #tpu.memory_space<vmem>>, vector<8x128xf32>
    tpu.vector_store %arg11[%c0_26, %c0_27], %66 {strides = array<i32>} : memref<8x128xf32, #tpu.memory_space<vmem>>, vector<8x128xf32>,
    %c0_28 = arith.constant 0 : index
    %c0_29 = arith.constant 0 : index
    %68 = vector.load %arg3[%c0_28, %c0_29] : memref<8x32xf32, #tpu.memory_space<vmem>>, vector<8x32xf32>
    %69 = arith.truncf %68 : vector<8x32xf32> to vector<8x32xbf16>
    %cst_30 = arith.constant dense<0.000000e+00> : vector<8x128xf32>
    %70 = tpu.matmul %69, %1, %cst_30 {dimension_numbers = #tpu.dot_dimension_numbers<[1], [0], [0], [1], [0, 0, 1, 1], [], []>} : vector<8x32xbf16>, vector<32x128xbf16>, vector<8x128xf32> -> vector<8x128xf32>
    %71 = arith.addf %7, %70 : vector<8x128xf32>
    %72 = vector.broadcast %3 : vector<1x128xf32> to vector<8x128xf32>
    %73 = arith.addf %71, %72 : vector<8x128xf32>
    %cst_31 = arith.constant 0.000000e+00 : f32
    %74 = vector.broadcast %cst_31 : f32 to vector<8x128xf32>
    %75 = arith.maximumf %73, %74 : vector<8x128xf32>
    %76 = arith.truncf %75 : vector<8x128xf32> to vector<8x128xbf16>
    %cst_32 = arith.constant dense<0.000000e+00> : vector<8x128xf32>
    %77 = tpu.matmul %76, %2, %cst_32 {dimension_numbers = #tpu.dot_dimension_numbers<[1], [0], [0], [1], [0, 0, 1, 1], [], []>} : vector<8x128xbf16>, vector<128x128xbf16>, vector<8x128xf32> -> vector<8x128xf32>
    %78 = vector.broadcast %4 : vector<1x128xf32> to vector<8x128xf32>
    %79 = arith.addf %77, %78 : vector<8x128xf32>
    %c0_33 = arith.constant 0 : index
    %c0_34 = arith.constant 0 : index
    %80 = vector.load %arg5[%c0_33, %c0_34] : memref<8x128xf32, #tpu.memory_space<vmem>>, vector<8x128xf32>
    %81 = tpu.iota {dimensions = array<i32: 1>} : vector<8x128xi32>
    %cst_35 = arith.constant dense<0xFF800000> : vector<8xf32>
    %82 = vector.multi_reduction <maximumf>, %79, %cst_35 [1] : vector<8x128xf32> to vector<8xf32>
    %83 = vector.shape_cast %82 : vector<8xf32> to vector<8x1xf32>
    %84 = vector.broadcast %83 : vector<8x1xf32> to vector<8x128xf32>
    %85 = arith.subf %79, %84 : vector<8x128xf32>
    %86 = math.exp %85 : vector<8x128xf32>
    %cst_36 = arith.constant dense<0.000000e+00> : vector<8xf32>
    %87 = vector.multi_reduction <add>, %86, %cst_36 [1] : vector<8x128xf32> to vector<8xf32>
    %88 = vector.shape_cast %87 : vector<8xf32> to vector<8x1xf32>
    %89 = math.log %88 : vector<8x1xf32>
    %90 = arith.addf %83, %89 : vector<8x1xf32>
    %91 = arith.addf %79, %80 : vector<8x128xf32>
    %cst_37 = arith.constant dense<0xFF800000> : vector<8xf32>
    %92 = vector.multi_reduction <maximumf>, %91, %cst_37 [1] : vector<8x128xf32> to vector<8xf32>
    %93 = vector.shape_cast %92 : vector<8xf32> to vector<8x1xf32>
    %94 = vector.broadcast %93 : vector<8x1xf32> to vector<8x128xf32>
    %95 = arith.cmpf oge, %91, %94 : vector<8x128xf32>
    %c128_i32_38 = arith.constant 128 : i32
    %96 = vector.broadcast %c128_i32_38 : i32 to vector<8x128xi32>
    %97 = arith.select %95, %81, %96 : vector<8x128xi1>, vector<8x128xi32>
    %cst_39 = arith.constant dense<2147483647> : vector<8xi32>
    %98 = vector.multi_reduction <minsi>, %97, %cst_39 [1] : vector<8x128xi32> to vector<8xi32>
    %99 = vector.shape_cast %98 : vector<8xi32> to vector<8x1xi32>
    %100 = vector.broadcast %99 : vector<8x1xi32> to vector<8x128xi32>
    %101 = arith.cmpi eq, %81, %100 : vector<8x128xi32>
    %cst_40 = arith.constant 0.000000e+00 : f32
    %102 = vector.broadcast %cst_40 : f32 to vector<8x128xf32>
    %103 = arith.select %101, %79, %102 : vector<8x128xi1>, vector<8x128xf32>
    %cst_41 = arith.constant dense<0.000000e+00> : vector<8xf32>
    %104 = vector.multi_reduction <add>, %103, %cst_41 [1] : vector<8x128xf32> to vector<8xf32>
    %105 = vector.shape_cast %104 : vector<8xf32> to vector<8x1xf32>
    %106 = arith.subf %105, %90 : vector<8x1xf32>
    %c8_i32_42 = arith.constant 8 : i32
    %107 = vector.broadcast %c8_i32_42 : i32 to vector<8x128xi32>
    %108 = arith.cmpi slt, %81, %107 : vector<8x128xi32>
    %cst_43 = arith.constant 0.000000e+00 : f32
    %109 = vector.broadcast %cst_43 : f32 to vector<8x128xf32>
    %110 = arith.select %108, %79, %109 : vector<8x128xi1>, vector<8x128xf32>
    %c8_i32_44 = arith.constant 8 : i32
    %111 = vector.broadcast %c8_i32_44 : i32 to vector<8x128xi32>
    %112 = arith.cmpi eq, %81, %111 : vector<8x128xi32>
    %113 = vector.shape_cast %90 : vector<8x1xf32> to vector<8x1xf32>
    %114 = vector.broadcast %113 : vector<8x1xf32> to vector<8x128xf32>
    %115 = arith.select %112, %114, %110 : vector<8x128xi1>, vector<8x128xf32>
    %c9_i32_45 = arith.constant 9 : i32
    %116 = vector.broadcast %c9_i32_45 : i32 to vector<8x128xi32>
    %117 = arith.cmpi eq, %81, %116 : vector<8x128xi32>
    %118 = arith.sitofp %99 : vector<8x1xi32> to vector<8x1xf32>
    %119 = vector.shape_cast %118 : vector<8x1xf32> to vector<8x1xf32>
    %120 = vector.broadcast %119 : vector<8x1xf32> to vector<8x128xf32>
    %121 = arith.select %117, %120, %115 : vector<8x128xi1>, vector<8x128xf32>
    %c10_i32_46 = arith.constant 10 : i32
    %122 = vector.broadcast %c10_i32_46 : i32 to vector<8x128xi32>
    %123 = arith.cmpi eq, %81, %122 : vector<8x128xi32>
    %124 = vector.shape_cast %106 : vector<8x1xf32> to vector<8x1xf32>
    %125 = vector.broadcast %124 : vector<8x1xf32> to vector<8x128xf32>
    %126 = arith.select %123, %125, %121 : vector<8x128xi1>, vector<8x128xf32>
    %c0_47 = arith.constant 0 : index
    %c0_48 = arith.constant 0 : index
    %127 = vector.load %arg12[%c0_47, %c0_48] : memref<8x128xf32, #tpu.memory_space<vmem>>, vector<8x128xf32>
    tpu.vector_store %arg12[%c0_47, %c0_48], %126 {strides = array<i32>} : memref<8x128xf32, #tpu.memory_space<vmem>>, vector<8x128xf32>,
    return
  }
  func.func @transform_0(%arg0: i32) -> (i32, i32) {
    %c0_i32 = arith.constant 0 : i32
    %c0_i32_0 = arith.constant 0 : i32
    return %arg0, %c0_i32 : i32, i32
  }
  func.func @transform_1(%arg0: i32) -> (i32, i32) {
    %c0_i32 = arith.constant 0 : i32
    %c0_i32_0 = arith.constant 0 : i32
    return %arg0, %c0_i32 : i32, i32
  }
  func.func @transform_2(%arg0: i32) -> (i32, i32) {
    %c0_i32 = arith.constant 0 : i32
    %c0_i32_0 = arith.constant 0 : i32
    return %arg0, %c0_i32 : i32, i32
  }
  func.func @transform_3(%arg0: i32) -> (i32, i32) {
    %c0_i32 = arith.constant 0 : i32
    %c0_i32_0 = arith.constant 0 : i32
    return %arg0, %c0_i32 : i32, i32
  }
  func.func @transform_4(%arg0: i32) -> (i32, i32) {
    %c0_i32 = arith.constant 0 : i32
    %c0_i32_0 = arith.constant 0 : i32
    return %arg0, %c0_i32 : i32, i32
  }
  func.func @transform_5(%arg0: i32) -> (i32, i32) {
    %c0_i32 = arith.constant 0 : i32
    %c0_i32_0 = arith.constant 0 : i32
    %c0_i32_1 = arith.constant 0 : i32
    return %c0_i32, %c0_i32_0 : i32, i32
  }
  func.func @transform_6(%arg0: i32) -> (i32, i32) {
    %c0_i32 = arith.constant 0 : i32
    %c0_i32_0 = arith.constant 0 : i32
    %c0_i32_1 = arith.constant 0 : i32
    return %c0_i32, %c0_i32_0 : i32, i32
  }
  func.func @transform_7(%arg0: i32) -> (i32, i32) {
    %c0_i32 = arith.constant 0 : i32
    %c0_i32_0 = arith.constant 0 : i32
    %c0_i32_1 = arith.constant 0 : i32
    return %c0_i32, %c0_i32_0 : i32, i32
  }
  func.func @transform_8(%arg0: i32) -> (i32, i32) {
    %c0_i32 = arith.constant 0 : i32
    %c0_i32_0 = arith.constant 0 : i32
    %c0_i32_1 = arith.constant 0 : i32
    return %c0_i32, %c0_i32_0 : i32, i32
  }
  func.func @transform_9(%arg0: i32) -> (i32, i32) {
    %c0_i32 = arith.constant 0 : i32
    %c0_i32_0 = arith.constant 0 : i32
    %c0_i32_1 = arith.constant 0 : i32
    return %c0_i32, %c0_i32_0 : i32, i32
  }
  func.func @transform_10(%arg0: i32) -> (i32, i32) {
    %c0_i32 = arith.constant 0 : i32
    %c0_i32_0 = arith.constant 0 : i32
    return %arg0, %c0_i32 : i32, i32
  }
  func.func @transform_11(%arg0: i32) -> (i32, i32) {
    %c0_i32 = arith.constant 0 : i32
    %c0_i32_0 = arith.constant 0 : i32
    return %arg0, %c0_i32 : i32, i32
  }
}

</mosaic_0001>

<bundles_post_ra>
// kernel: edges_model_categorical_forward.1
= control target key start
LH: loop header
LB: loop body
LE: loop exit
PB: predicated region body
PF: predicated region fallthrough
CT: control target
= control target key end

     0   :  { %v598_v0 = vmov 0.0   ;;  %vm599_vm0 = vmmov 0   ;;  %vm78_vm1 = vcmask 261120   ;;  %v284_v55 = vlaneseq  ;;  %s790_s5 = inlined_call_operand.vmem [shape: bf16[32,128], index: 5, kind: input, shape index: {}]   ;;  %s791_s6 = inlined_call_operand.vmem [shape: bf16[32,128], index: 6, kind: input, shape index: {}]   ;;  %s792_s0 = inlined_call_operand.vmem [shape: f32[8,32], index: 0, kind: input, shape index: {}]   ;;  %s793_s1 = inlined_call_operand.vmem [shape: f32[8,32], index: 1, kind: input, shape index: {}]   ;;  %s794_s8 = inlined_call_operand.vmem [shape: bf16[128,128], index: 8, kind: input, shape index: {}]   ;;  %s795_s2 = inlined_call_operand.vmem [shape: f32[8,32], index: 2, kind: input, shape index: {}]   ;;  %s796_s7 = inlined_call_operand.vmem [shape: f32[1,128], index: 7, kind: input, shape index: {}]   ;;  %s797_s9 = inlined_call_operand.vmem [shape: f32[1,128], index: 9, kind: input, shape index: {}]   ;;  %s798_s3 = inlined_call_operand.vmem [shape: f32[8,128], index: 3, kind: input, shape index: {}]   ;;  %s799_s4 = inlined_call_operand.vmem [shape: f32[8,128], index: 4, kind: input, shape index: {}]   ;;  %s800_s10 = inlined_call_operand.vmem [shape: f32[8,128], index: 10, kind: output, shape index: {0}]   ;;  %s801_s11 = inlined_call_operand.vmem [shape: f32[8,128], index: 11, kind: output, shape index: {1}]  }
   0x1   :  { %512 = vmatprep.subr.bf16.mxu0 %v598_v0  ;;  %520 = vmatprep.subr.bf16.mxu1 %v598_v0  ;;  %v578_v1 = vld [vmem:[%s790_s5] sm:$0xff]   ;;  %v580_v3 = vld [vmem:[%s790_s5 + $0x8] sm:$0xff]   ;;  %v584_v13 = vld [vmem:[%s794_s8 + $0x10] sm:$0xff]  }
   0x2   :  { %v579_v2 = vld [vmem:[%s791_s6] sm:$0xff]   ;;  %516 = vmatprep.mubr.msk.bf16.mxu0 %vm599_vm0, %v598_v0  ;;  %524 = vmatprep.mubr.msk.bf16.mxu1 %vm599_vm0, %v598_v0  ;;  %v581_v4 = vld [vmem:[%s791_s6 + $0x8] sm:$0xff]   ;;  %v585_v14 = vld [vmem:[%s794_s8 + $0x18] sm:$0xff]   ;;  %v759_v56 = vand.u32 127, %v284_v55 }
   0x3   :  { %513 = vmatpush3.bf16.msra.mxu0 %v578_v1  ;;  %521 = vmatpush3.bf16.msra.mxu1 %v579_v2  ;;  %v64_v5 = vld [vmem:[%s792_s0] sm:$0xff]  ;;  %v583_v11 = vld [vmem:[%s794_s8 + $0x8] sm:$0xff]   ;;  %v588_v17 = vld [vmem:[%s794_s8 + $0x30] sm:$0xff]  }
   0x4   :  { %514 = vmatprep.subr.bf16.mxu0 %v598_v0  ;;  %522 = vmatprep.subr.bf16.mxu1 %v598_v0  ;;  %v122_v6 = vld [vmem:[%s793_s1] sm:$0xff]  ;;  %v65_v7 = vpack.c.bf16 %v64_v5, %v64_v5  ;;  %v587_v16 = vld [vmem:[%s794_s8 + $0x28] sm:$0xff]   ;;  %v589_v18 = vld [vmem:[%s794_s8 + $0x38] sm:$0xff]   ;;  %vm320_vm8 = vcmp.lt.s32.totalorder %v759_v56, 8  ;;  %vm322_vm9 = vcmp.eq.s32.totalorder %v759_v56, 8  ;;  %vm324_vm10 = vcmp.eq.s32.totalorder %v759_v56, 9 }
   0x5   :  { %v123_v8 = vpack.c.bf16 %v122_v6, %v122_v6  ;;  %v582_v9 = vld [vmem:[%s794_s8] sm:$0xff]   ;;  %vm327_vm11 = vcmp.eq.s32.totalorder %v759_v56, 10 }
   0x6   :  { %v330_v10 = vld [vmem:[%s795_s2] sm:$0xff] }
   0x7   :  { %515 = vmatpush3.bf16.msra.mxu0 %v580_v3  ;;  %523 = vmatpush3.bf16.msra.mxu1 %v581_v4  ;;  %v331_v12 = vpack.c.bf16 %v330_v10, %v330_v10  ;;  %v586_v15 = vld [vmem:[%s794_s8 + $0x20] sm:$0xff]  }
   0x8   :  { %528 = vmatprep.subr.bf16.mxu0 %v598_v0  ;;  %548 = vmatprep.subr.bf16.mxu1 %v598_v0  ;;  %v474_v20 = vld [vmem:[%s796_s7] ss:$0 sm:$0xff] }
   0x9   :  { %v475_v40 = vld [vmem:[%s797_s9] ss:$0 sm:$0xff] }
   0xa   :  { %517 = vmatmul.mubr.msk.bf16.vlgmr.msra.gmra.mrb[0].mxu0 %vm78_vm1, %v65_v7  ;;  %525 = vmatmul.mubr.msk.bf16.vlgmr.msra.gmra.mrb[0].mxu1 %vm78_vm1, %v123_v8  ;;  %v283_v42 = vld [vmem:[%s798_s3] sm:$0xff] }
   0xb   :  { %529 = vmatpush3.bf16.msra.mxu0 %v582_v9  ;;  %549 = vmatpush3.bf16.msra.mxu1 %v579_v2  ;;  %v419_v49 = vld [vmem:[%s799_s4] sm:$0xff] }
   0xc   :  { %552 = vmatprep.mubr.msk.bf16.mxu1 %vm599_vm0, %v598_v0  ;;  %550 = vmatprep.subr.bf16.mxu1 %v598_v0 }
   0xd   :  { %530 = vmatprep.subr.bf16.mxu0 %v598_v0  ;;  %544 = vmatprep.mubr.msk.bf16.mxu0 %vm599_vm0, %v598_v0 }
   0xf   :  { %531 = vmatpush3.bf16.msra.mxu0 %v583_v11  ;;  %551 = vmatpush3.bf16.msra.mxu1 %v581_v4 }
  0x10   :  { %532 = vmatprep.subr.bf16.mxu0 %v598_v0  ;;  %556 = vmatprep.subr.bf16.mxu1 %v598_v0 }
  0x12   :  { %553 = vmatmul.mubr.msk.bf16.vlgmr.msra.gmra.mrb[4].mxu1 %vm78_vm1, %v331_v12 }
  0x13   :  { %533 = vmatpush3.bf16.msra.mxu0 %v584_v13  ;;  %557 = vmatpush3.bf16.msra.mxu1 %v582_v9 }
  0x14   :  { %534 = vmatprep.subr.bf16.mxu0 %v598_v0  ;;  %558 = vmatprep.subr.bf16.mxu1 %v598_v0 }
  0x15   :  { %572 = vmatprep.mubr.msk.bf16.mxu1 %vm599_vm0, %v598_v0 }
  0x17   :  { %535 = vmatpush3.bf16.msra.mxu0 %v585_v14  ;;  %559 = vmatpush3.bf16.msra.mxu1 %v583_v11 }
  0x18   :  { %536 = vmatprep.subr.bf16.mxu0 %v598_v0  ;;  %560 = vmatprep.subr.bf16.mxu1 %v598_v0 }
  0x1b   :  { %537 = vmatpush3.bf16.msra.mxu0 %v586_v15  ;;  %561 = vmatpush3.bf16.msra.mxu1 %v584_v13 }
  0x1c   :  { %538 = vmatprep.subr.bf16.mxu0 %v598_v0  ;;  %562 = vmatprep.subr.bf16.mxu1 %v598_v0 }
  0x1f   :  { %539 = vmatpush3.bf16.msra.mxu0 %v587_v16  ;;  %563 = vmatpush3.bf16.msra.mxu1 %v585_v14 }
  0x20   :  { %540 = vmatprep.subr.bf16.mxu0 %v598_v0  ;;  %564 = vmatprep.subr.bf16.mxu1 %v598_v0 }
  0x23   :  { %565 = vmatpush3.bf16.msra.mxu1 %v586_v15  ;;  %541 = vmatpush3.bf16.msra.mxu0 %v588_v17 }
  0x24   :  { %566 = vmatprep.subr.bf16.mxu1 %v598_v0  ;;  %542 = vmatprep.subr.bf16.mxu0 %v598_v0 }
  0x27   :  { %567 = vmatpush3.bf16.msra.mxu1 %v587_v16  ;;  %543 = vmatpush3.bf16.msra.mxu0 %v589_v18 }
  0x28   :  { %568 = vmatprep.subr.bf16.mxu1 %v598_v0 }
  0x2b   :  { %569 = vmatpush3.bf16.msra.mxu1 %v588_v17 }
  0x2c   :  { %570 = vmatprep.subr.bf16.mxu1 %v598_v0 }
  0x2f   :  { %571 = vmatpush3.bf16.msra.mxu1 %v589_v18 }
  0xdd   :  { %v116_v19 = vpop.f32.mrb[0].mxu0  ;;  %v173_v21 = vpop.f32.mrb[0].mxu1 }
  0xde   :  { %v518_v22 = vpop.f32.mrb[1].mxu0  ;;  %v179_v23 = vadd.f32 %v173_v21, %v116_v19  ;;  %v526_v24 = vpop.f32.mrb[1].mxu1 }
  0xdf   :  { %v119_v25 = vpop.f32.mrb[2].mxu0  ;;  %v176_v26 = vpop.f32.mrb[2].mxu1 }
  0xe0   :  { %v519_v27 = vpop.f32.mrb[3].mxu0  ;;  %v186_v28 = vadd.f32 %v474_v20, %v179_v23  ;;  %v527_v29 = vpop.f32.mrb[3].mxu1 }
  0xe2   :  { %v187_v30 = vmax.f32 %v186_v28, 0.0 }
  0xe4   :  { %v188_v31 = vpack.c.bf16 %v187_v30, %v187_v30 }
  0xe5   :  { %v369_v32 = vpop.f32.mrb[4].mxu1 }
  0xe6   :  { %v375_v33 = vadd.f32 %v369_v32, %v116_v19  ;;  %545 = vmatmul.mubr.bf16.vlgmr.msra.gmra.mrb[4].mxu0 %v188_v31  ;;  %v554_v34 = vpop.f32.mrb[5].mxu1 }
  0xe7   :  { %v372_v35 = vpop.f32.mrb[6].mxu1 }
  0xe8   :  { %v376_v36 = vadd.f32 %v474_v20, %v375_v33  ;;  %v555_v37 = vpop.f32.mrb[7].mxu1 }
  0xea   :  { %v377_v38 = vmax.f32 %v376_v36, 0.0 }
  0xec   :  { %v378_v39 = vpack.c.bf16 %v377_v38, %v377_v38 }
  0xee   :  { %573 = vmatmul.mubr.bf16.vlgmr.msra.gmra.mrb[8].mxu1 %v378_v39 }
 0x1b9   :  { %v277_v41 = vpop.f32.mrb[4].mxu0 }
 0x1ba   :  { %v749_v43 = vadd.f32 %v475_v40, %v277_v41  ;;  %v546_v44 = vpop.f32.mrb[5].mxu0 }
 0x1bb   :  { %v280_v45 = vpop.f32.mrb[6].mxu0 }
 0x1bc   :  { %v547_v46 = vpop.f32.mrb[7].mxu0  ;;  %v296_v47 = vadd.f32 %v283_v42, %v749_v43  ;;  %v321_v35 = vsel %vm320_vm8, %v749_v43, 0.0 }
 0x1be   :  { %297 = vmax.xlane.f32.xlu0 %v296_v47 }
 0x1c1   :  { %v413_v48 = vpop.f32.mrb[8].mxu1 }
 0x1c2   :  { %v755_v50 = vadd.f32 %v475_v40, %v413_v48  ;;  %v574_v51 = vpop.f32.mrb[9].mxu1 }
 0x1c3   :  { %v416_v52 = vpop.f32.mrb[10].mxu1 }
 0x1c4   :  { %v575_v53 = vpop.f32.mrb[11].mxu1  ;;  %v430_v54 = vadd.f32 %v419_v49, %v755_v50 }
 0x1c6   :  { %431 = vmax.xlane.f32.xlu0 %v430_v54 }
 0x1ca   :  { %286 = vmax.xlane.f32.xlu0 %v749_v43 }
 0x24b   :  { %v298_v57 = vpop.xlane.xlu0 %297 }
 0x24c   :  { %vm299_vm2 = vcmp.ge.f32.partialorder %v296_v47, %v298_v57 }
 0x24d   :  { %v300_v58 = vsel %vm299_vm2, %v759_v56, 128 }
 0x24e   :  { %v302_v59 = vshra.s32 %v300_v58, 16  ;;  %v301_v4 = vand.u32 65535, %v300_v58 }
 0x250   :  { %v304_v60 = vcvt.s32.f32 %v302_v59  ;;  %v303_v6 = vcvt.s32.f32 %v301_v4 }
 0x252   :  { %305 = vmin.xlane.f32.xlu1 %v304_v60 }
 0x253   :  { %v432_v61 = vpop.xlane.xlu0 %431 }
 0x254   :  { %vm433_vm3 = vcmp.ge.f32.partialorder %v430_v54, %v432_v61 }
 0x255   :  { %v434_v62 = vsel %vm433_vm3, %v759_v56, 128 }
 0x256   :  { %v436_v63 = vshra.s32 %v434_v62, 16  ;;  %v435_v8 = vand.u32 65535, %v434_v62 }
 0x257   :  { %v287_v1 = vpop.xlane.xlu0 %286 }
 0x258   :  { %v438_v0 = vcvt.s32.f32 %v436_v63  ;;  %v288_v2 = vsub.f32 %v749_v43, %v287_v1  ;;  %v437_v11 = vcvt.s32.f32 %v435_v8 }
 0x25a   :  { %439 = vmin.xlane.f32.xlu1 %v438_v0  ;;  %v289_v3 = vmul.f32 1.442695, %v288_v2 }
 0x25c   :  { %590 = vpow2.f32 %v289_v3 }
 0x25e   :  { %420 = vmax.xlane.f32.xlu1 %v755_v50 }
 0x266   :  { %v591_v9 = vpop.eup %590 }
 0x2df   :  { %v306_v5 = vpop.xlane.xlu1 %305 }
 0x2e0   :  { %vm307_vm4 = vcmp.eq.f32.partialorder %v304_v60, %v306_v5  ;;  %v312_v17 = vcvt.f32.s32 %v306_v5 }
 0x2e1   :  { %v308_v7 = vsel %vm307_vm4, %v303_v6, inf }
 0x2e2   :  { %309 = vmin.xlane.f32.xlu0 %v308_v7  ;;  %v313_v19 = vshll.u32 %v312_v17, 16 }
 0x2e6   :  { %291 = vadd.xlane.f32.xlu0 %v591_v9 }
 0x2e7   :  { %v440_v10 = vpop.xlane.xlu1 %439 }
 0x2e8   :  { %vm441_vm5 = vcmp.eq.f32.partialorder %v438_v0, %v440_v10  ;;  %v446_v22 = vcvt.f32.s32 %v440_v10 }
 0x2e9   :  { %v442_v12 = vsel %vm441_vm5, %v437_v11, inf }
 0x2ea   :  { %443 = vmin.xlane.f32.xlu1 %v442_v12  ;;  %v447_v25 = vshll.u32 %v446_v22, 16 }
 0x2eb   :  { %v421_v13 = vpop.xlane.xlu1 %420 }
 0x2ec   :  { %v422_v14 = vsub.f32 %v755_v50, %v421_v13 }
 0x2ee   :  { %v423_v15 = vmul.f32 1.442695, %v422_v14 }
 0x2f0   :  { %592 = vpow2.f32 %v423_v15 }
 0x2fa   :  { %v593_v16 = vpop.eup %592 }
 0x2fb   :  { %425 = vadd.xlane.f32.xlu1 %v593_v16 }
 0x36f   :  { %v310_v18 = vpop.xlane.xlu0 %309 }
 0x370   :  { %v311_v20 = vcvt.f32.s32 %v310_v18 }
 0x372   :  { %v314_v21 = vadd.s32 %v313_v19, %v311_v20 }
 0x373   :  { %v292_v29 = vpop.xlane.xlu0 %291 }
 0x374   :  { %vm315_vm6 = vcmp.eq.s32.totalorder %v759_v56, %v314_v21  ;;  %594 = vlog2.f32 %v292_v29  ;;  %v325_v38 = vcvt.s32.f32 %v314_v21 }
 0x375   :  { %v316_v23 = vsel %vm315_vm6, %v749_v43, 0.0  ;;  %v454_v43 = vsel %vm320_vm8, %v755_v50, 0.0 }
 0x376   :  { %317 = vadd.xlane.f32.xlu0 %v316_v23 }
 0x377   :  { %v444_v24 = vpop.xlane.xlu1 %443 }
 0x378   :  { %v445_v26 = vcvt.f32.s32 %v444_v24 }
 0x37a   :  { %v448_v27 = vadd.s32 %v447_v25, %v445_v26 }
 0x37c   :  { %vm449_vm7 = vcmp.eq.s32.totalorder %v759_v56, %v448_v27  ;;  %v456_v46 = vcvt.s32.f32 %v448_v27 }
 0x37d   :  { %v450_v28 = vsel %vm449_vm7, %v755_v50, 0.0 }
 0x37e   :  { %451 = vadd.xlane.f32.xlu1 %v450_v28  ;;  %v595_v31 = vpop.eup %594 }
 0x37f   :  { %v294_v32 = vmul.f32 0.6931472, %v595_v31 }
 0x381   :  { %v295_v33 = vadd.f32 %v294_v32, %v287_v1 }
 0x383   :  { %v323_v37 = vsel %vm322_vm9, %v295_v33, %v321_v35 }
 0x384   :  { %v326_v41 = vsel %vm324_vm10, %v325_v38, %v323_v37 }
 0x388   :  { %v426_v30 = vpop.xlane.xlu1 %425 }
 0x389   :  { %596 = vlog2.f32 %v426_v30 }
 0x393   :  { %v597_v34 = vpop.eup %596 }
 0x394   :  { %v428_v36 = vmul.f32 0.6931472, %v597_v34 }
 0x396   :  { %v429_v44 = vadd.f32 %v428_v36, %v421_v13 }
 0x398   :  { %v455_v45 = vsel %vm322_vm9, %v429_v44, %v454_v43 }
 0x399   :  { %v457_v49 = vsel %vm324_vm10, %v456_v46, %v455_v45 }
 0x403   :  { %v318_v39 = vpop.xlane.xlu0 %317 }
 0x404   :  { %v319_v40 = vsub.f32 %v318_v39, %v295_v33 }
 0x406   :  { %v328_v42 = vsel %vm327_vm11, %v319_v40, %v326_v41 }
 0x407   :  { %329 = vst [vmem:[%s800_s10] sm:$0xff] %v328_v42 }
 0x40b   :  { %v452_v47 = vpop.xlane.xlu1 %451 }
 0x40c   :  { %v453_v48 = vsub.f32 %v452_v47, %v429_v44 }
 0x40e   :  { %v458_v51 = vsel %vm327_vm11, %v453_v48, %v457_v49 }
 0x40f   :  { %459 = vst [vmem:[%s801_s11] sm:$0xff] %v458_v51 }

</bundles_post_ra>
